<compile_context>
chip_gen: v7x
topology: tpu7x:2x2x1
jax: 0.10.0
libtpu: 0.0.40
codegen_flags: <defaults>
</compile_context>

<pallas_src>
import functools
import math

import jax
import jax.numpy as jnp
from jax.experimental import pallas as pl
from jax.experimental.pallas import tpu as pltpu


def _sinusoidal_kernel(x_ref, sf_ref, ph_ref, out_ref, *, r_fold: int):
    """One grid step: embed tb*r_fold time values into a lane-dense slab.

    x_ref:   (tb, r_fold)        f32  -- r_fold consecutive time values per folded row
    sf_ref:  (1, dim)            f32  -- 2*pi / 20**(2*(c mod half)/dim)
    ph_ref:  (1, dim)            f32  -- 0 on sin lanes, pi/2 on cos lanes
    out_ref: (tb, r_fold * dim)  f32
    """
    x = x_ref[...]
    sf = sf_ref[...]
    ph = ph_ref[...]
    # cos(a) == sin(a + pi/2): one transcendental per output element.
    # Piece r covers output lanes [r*dim, (r+1)*dim) of the folded row.
    pieces = [x[:, r:r + 1] * sf + ph for r in range(r_fold)]
    ang = pieces[0] if r_fold == 1 else jnp.concatenate(pieces, axis=-1)
    out_ref[...] = jnp.sin(ang)


def sinusoidal_embedding(inputs: jax.Array, dim: int) -> jax.Array:
    """Pallas-backed equivalent of SinusoidalEmbedding(dim).forward(inputs)."""
    assert dim % 2 == 0
    assert inputs.shape[-1] == 1
    half = dim // 2

    lead_shape = inputs.shape[:-1]
    b = math.prod(lead_shape)  # static; no device sync

    # Fold r_fold consecutive rows into one output row so the stored row width
    # (r_fold * dim) is a multiple of 128 lanes.  r_fold == 1 when 128 | dim.
    r_fold = 128 // math.gcd(dim, 128)
    row_elems = r_fold * dim
    row_bytes = row_elems * 4

    # Tile over folded rows, targeting ~4 MiB f32 output tiles (double-buffered
    # -> <= ~8 MiB, comfortably inside v7x's VMEM budget).
    g_needed = -(-b // r_fold)                                # folded rows needed
    tb = max(8, ((4 * 1024 * 1024) // row_bytes) // 8 * 8)    # rows per tile
    tb = min(tb, max(8, -(-g_needed // 8) * 8))               # don't exceed needed rows
    g_pad = -(-g_needed // tb) * tb                           # pad to full tiles
    b_pad = g_pad * r_fold
    grid = g_pad // tb

    x_flat = inputs.reshape(b).astype(jnp.float32)
    if b_pad != b:
        x_flat = jnp.pad(x_flat, (0, b_pad - b))
    x_folded = x_flat.reshape(g_pad, r_fold)                  # free row-major reshape

    # Host-side "parameter" tables: scaled frequencies and sin/cos phase shift.
    c = jnp.arange(dim, dtype=jnp.float32)
    k = jnp.where(c < half, c, c - half)
    sf = ((2.0 * math.pi) / (20.0 ** (2.0 * k / dim))).reshape(1, dim).astype(jnp.float32)
    ph = jnp.where(c < half, 0.0, 0.5 * math.pi).reshape(1, dim).astype(jnp.float32)

    kernel = functools.partial(_sinusoidal_kernel, r_fold=r_fold)

    out_folded = pl.pallas_call(
        kernel,
        out_shape=jax.ShapeDtypeStruct((g_pad, row_elems), jnp.float32),
        grid=(grid,),
        in_specs=[
            pl.BlockSpec((tb, r_fold), lambda i: (i, 0)),
            pl.BlockSpec((1, dim), lambda i: (0, 0)),
            pl.BlockSpec((1, dim), lambda i: (0, 0)),
        ],
        out_specs=pl.BlockSpec((tb, row_elems), lambda i: (i, 0)),
        compiler_params=pltpu.CompilerParams(
            dimension_semantics=("parallel",),
            vmem_limit_bytes=32 * 1024 * 1024,
        ),
        cost_estimate=pl.CostEstimate(
            flops=2 * g_pad * row_elems,
            transcendentals=g_pad * row_elems,
            bytes_accessed=4 * (g_pad * row_elems + g_pad * r_fold + 2 * dim),
        ),
    )(x_folded, sf, ph)

    # Unfold (free row-major reshape), drop padding, restore leading dims.
    out2d = out_folded.reshape(b_pad, dim)[:b]
    return out2d.reshape(*lead_shape, dim)


def _reference(inputs: jax.Array, dim: int) -> jax.Array:
    """Pure-JAX reference for correctness check."""
    half = dim // 2
    i = jnp.arange(half, dtype=jnp.float32)
    inv_freq = 1.0 / (20.0 ** (2.0 * i / dim))
    angles = 2.0 * math.pi * inputs.astype(jnp.float32) * inv_freq  # [..., half]
    return jnp.concatenate([jnp.sin(angles), jnp.cos(angles)], axis=-1)


if __name__ == "__main__":
    key = jax.random.PRNGKey(0)
    k1, k2 = jax.random.split(key)

    # Time steps in [0, 1], shape [batch, 1] as the module expects (dim=32
    # exercises the lane-dense folding path: r_fold = 4, row width 128).
    t1 = jax.random.uniform(k1, (8, 1), dtype=jnp.float32)
    out1 = jax.block_until_ready(sinusoidal_embedding(t1, 32))
    ref1 = _reference(t1, 32)
    assert out1.shape == (8, 32), out1.shape
    assert jnp.allclose(out1, ref1, atol=1e-5, rtol=1e-5), float(
        jnp.max(jnp.abs(out1 - ref1))
    )

    # Extra leading dims + a batch that needs padding (dim=64 -> r_fold=2).
    t2 = jax.random.uniform(k2, (3, 5, 1), dtype=jnp.float32)
    out2 = jax.block_until_ready(sinusoidal_embedding(t2, 64))
    ref2 = _reference(t2, 64)
    assert out2.shape == (3, 5, 64), out2.shape
    assert jnp.allclose(out2, ref2, atol=1e-5, rtol=1e-5), float(
        jnp.max(jnp.abs(out2 - ref2))
    )

    print("KERNEL_OK")
</pallas_src>

<mosaic_0001>
module attributes {stable_mosaic.version = 11 : i64} {
  func.func @_sinusoidal_kernel(%arg0: i32, %arg1: memref<8x4xf32, #tpu.memory_space<vmem>>, %arg2: memref<1x32xf32, #tpu.memory_space<vmem>>, %arg3: memref<1x32xf32, #tpu.memory_space<vmem>>, %arg4: memref<8x128xf32, #tpu.memory_space<vmem>>) attributes {dimension_semantics = [#tpu.dimension_semantics<parallel>], iteration_bounds = array<i64: 1>, scalar_prefetch = 0 : i64, scratch_operands = 0 : i64, tpu.core_type = #tpu.core_type<tc>, window_params = [{transform_indices = @transform_0, window_bounds = array<i64: 8, 4>}, {pipeline_mode = #tpu.pipeline_mode<synchronous>, transform_indices = @transform_1, window_bounds = array<i64: 1, 32>}, {pipeline_mode = #tpu.pipeline_mode<synchronous>, transform_indices = @transform_2, window_bounds = array<i64: 1, 32>}, {transform_indices = @transform_3, window_bounds = array<i64: 8, 128>}]} {
    %c0 = arith.constant 0 : index
    %c0_0 = arith.constant 0 : index
    %0 = vector.load %arg1[%c0, %c0_0] : memref<8x4xf32, #tpu.memory_space<vmem>>, vector<8x4xf32>
    %c0_1 = arith.constant 0 : index
    %c0_2 = arith.constant 0 : index
    %1 = vector.load %arg2[%c0_1, %c0_2] : memref<1x32xf32, #tpu.memory_space<vmem>>, vector<1x32xf32>
    %c0_3 = arith.constant 0 : index
    %c0_4 = arith.constant 0 : index
    %2 = vector.load %arg3[%c0_3, %c0_4] : memref<1x32xf32, #tpu.memory_space<vmem>>, vector<1x32xf32>
    %3 = vector.extract_strided_slice %0 {offsets = [0, 0], sizes = [8, 1], strides = [1, 1]} : vector<8x4xf32> to vector<8x1xf32>
    %4 = vector.broadcast %3 : vector<8x1xf32> to vector<8x32xf32>
    %5 = vector.broadcast %1 : vector<1x32xf32> to vector<8x32xf32>
    %6 = arith.mulf %4, %5 : vector<8x32xf32>
    %7 = vector.broadcast %2 : vector<1x32xf32> to vector<8x32xf32>
    %8 = arith.addf %6, %7 : vector<8x32xf32>
    %9 = vector.extract_strided_slice %0 {offsets = [0, 1], sizes = [8, 1], strides = [1, 1]} : vector<8x4xf32> to vector<8x1xf32>
    %10 = vector.broadcast %9 : vector<8x1xf32> to vector<8x32xf32>
    %11 = vector.broadcast %1 : vector<1x32xf32> to vector<8x32xf32>
    %12 = arith.mulf %10, %11 : vector<8x32xf32>
    %13 = vector.broadcast %2 : vector<1x32xf32> to vector<8x32xf32>
    %14 = arith.addf %12, %13 : vector<8x32xf32>
    %15 = vector.extract_strided_slice %0 {offsets = [0, 2], sizes = [8, 1], strides = [1, 1]} : vector<8x4xf32> to vector<8x1xf32>
    %16 = vector.broadcast %15 : vector<8x1xf32> to vector<8x32xf32>
    %17 = vector.broadcast %1 : vector<1x32xf32> to vector<8x32xf32>
    %18 = arith.mulf %16, %17 : vector<8x32xf32>
    %19 = vector.broadcast %2 : vector<1x32xf32> to vector<8x32xf32>
    %20 = arith.addf %18, %19 : vector<8x32xf32>
    %21 = vector.extract_strided_slice %0 {offsets = [0, 3], sizes = [8, 1], strides = [1, 1]} : vector<8x4xf32> to vector<8x1xf32>
    %22 = vector.broadcast %21 : vector<8x1xf32> to vector<8x32xf32>
    %23 = vector.broadcast %1 : vector<1x32xf32> to vector<8x32xf32>
    %24 = arith.mulf %22, %23 : vector<8x32xf32>
    %25 = vector.broadcast %2 : vector<1x32xf32> to vector<8x32xf32>
    %26 = arith.addf %24, %25 : vector<8x32xf32>
    %27 = tpu.concatenate %8, %14, %20, %26 in 1 : vector<8x32xf32>, vector<8x32xf32>, vector<8x32xf32>, vector<8x32xf32> -> vector<8x128xf32>
    %28 = math.sin %27 : vector<8x128xf32>
    %c0_5 = arith.constant 0 : index
    %c0_6 = arith.constant 0 : index
    %29 = vector.load %arg4[%c0_5, %c0_6] : memref<8x128xf32, #tpu.memory_space<vmem>>, vector<8x128xf32>
    tpu.vector_store %arg4[%c0_5, %c0_6], %28 {strides = array<i32>} : memref<8x128xf32, #tpu.memory_space<vmem>>, vector<8x128xf32>,
    return
  }
  func.func @transform_0(%arg0: i32) -> (i32, i32) {
    %c0_i32 = arith.constant 0 : i32
    %c0_i32_0 = arith.constant 0 : i32
    return %arg0, %c0_i32 : i32, i32
  }
  func.func @transform_1(%arg0: i32) -> (i32, i32) {
    %c0_i32 = arith.constant 0 : i32
    %c0_i32_0 = arith.constant 0 : i32
    %c0_i32_1 = arith.constant 0 : i32
    return %c0_i32, %c0_i32_0 : i32, i32
  }
  func.func @transform_2(%arg0: i32) -> (i32, i32) {
    %c0_i32 = arith.constant 0 : i32
    %c0_i32_0 = arith.constant 0 : i32
    %c0_i32_1 = arith.constant 0 : i32
    return %c0_i32, %c0_i32_0 : i32, i32
  }
  func.func @transform_3(%arg0: i32) -> (i32, i32) {
    %c0_i32 = arith.constant 0 : i32
    %c0_i32_0 = arith.constant 0 : i32
    return %arg0, %c0_i32 : i32, i32
  }
}

</mosaic_0001>

<bundles_post_ra>
// kernel: tpu_custom_call.1
= control target key start
LH: loop header
LB: loop body
LE: loop exit
PB: predicated region body
PF: predicated region fallthrough
CT: control target
= control target key end

     0   :  { %v249_v1 = vmov 1   ;;  %v250_v2 = vmov 3   ;;  %s325_s0 = inlined_call_operand.vmem [shape: f32[8,4], index: 0, kind: input, shape index: {}]   ;;  %s326_s1 = inlined_call_operand.vmem [shape: f32[1,32], index: 1, kind: input, shape index: {}]   ;;  %s327_s2 = inlined_call_operand.vmem [shape: f32[1,32], index: 2, kind: input, shape index: {}]   ;;  %s328_s3 = inlined_call_operand.hbm [shape: f32[8,128], index: 3, kind: output, shape index: {}]  }
   0x1   :  { %v15_v0 = vld [vmem:[%s325_s0] sm:$0xff]  ;;  %216 = vset.pattern.permute.xlu0 %v249_v1  ;;  %218 = vset.pattern.permute.xlu1 %v250_v2 }
   0x2   :  { %8 = vsyncpa [#allocation3], 0  ;;  %38 = vperm.xlu0 %216, %v15_v0   ;;  %50 = vperm.xlu1 %218, %v15_v0   ;;  %v251_v3 = vmov 2   ;;  %v252_v4 = vmov 0   ;;  %v192_v5 = vld [vmem:[%s326_s1] ss:$0 sm:$0xff] }
   0x3   :  { %v193_v6 = vld [vmem:[%s327_s2] ss:$0 sm:$0xff]  ;;  %s253_s17 = smov 32   ;;  %s254_s18 = smov 96   ;;  %vm67_vm0 = vcmask 261120   ;;  %vm69_vm1 = vcmask 523264  }
   0x4   :  { %s255_s1 = smov 64   ;;  %vm71_vm2 = vcmask 785408   ;;  %v256_v35 = vmov 683565275   ;;  %v257_v37 = vmov 2475754826  }
   0x5   :  { %v258_v40 = vmov 2131351028   ;;  %v259_v43 = vmov 2102212464   ;;  %v260_v46 = vmov 920167782  }
   0x6   :  { %217 = vset.pattern.permute.xlu0 %v251_v3  ;;  %219 = vset.pattern.permute.xlu1 %v252_v4  ;;  %v261_v49 = vmov 1326507024   ;;  %s262_s2 = smov [#allocation2]  }
   0x7   :  { %44 = vperm.xlu0 %217, %v15_v0   ;;  %20 = vperm.xlu1 %219, %v15_v0   ;;  %s184_s19 = sshll.u32 %s262_s2, 4  ;;  %s185_s19 = int_to_ptr.vmem [resolvable:$true] %s184_s19 }
   0x8   :  { %s225_s20 = scalar_lea.vmem %s185_s19, 128  ;;  %p230_p1 = scmp.lt.s32.totalorder %s185_s19, %s185_s19 }
   0x9   :  { %p226_p0 = scmp.ne.s32.totalorder %s185_s19, %s225_s20  ;;  %p231_p2 = scmp.lt.s32.totalorder %s225_s20, %s225_s20 }
   0xb   :  { %220 = vset.pattern.permute.xlu0 %v250_v2  ;;  %p232_p3 = por %p231_p2, %p230_p1 }
   0xd   :  { %p233_p4 = pnand %p232_p3, %p226_p0 }
  0x81   :  { %v39_v7 = vpop.permute.xlu0 %38  ;;  %v51_v8 = vpop.permute.xlu1 %50 }
  0x82   :  { %v41_v9 = vmul.f32 %v192_v5, %v39_v7  ;;  %v53_v10 = vmul.f32 %v192_v5, %v51_v8 }
  0x84   :  { %v42_v11 = vadd.f32 %v193_v6, %v41_v9  ;;  %v54_v13 = vadd.f32 %v193_v6, %v53_v10 }
  0x86   :  { %56 = vrot.lane.b32.xlu1 %v42_v11, %s253_s17  ;;  %v45_v12 = vpop.permute.xlu0 %44  ;;  %v21_v14 = vpop.permute.xlu1 %20 }
  0x87   :  { %v47_v15 = vmul.f32 %v192_v5, %v45_v12  ;;  %v29_v16 = vmul.f32 %v192_v5, %v21_v14 }
  0x89   :  { %v48_v17 = vadd.f32 %v193_v6, %v47_v15  ;;  %v36_v18 = vadd.f32 %v193_v6, %v29_v16 }
  0x8a   :  { %64 = vrot.lane.b32.xlu1 %v54_v13, %s254_s18 }
  0x8b   :  { %60 = vrot.lane.b32.xlu0 %v48_v17, %s255_s1 }
  0xf8   :  { %v57_v19 = vpop.permute.xlu1 %56 }
  0xf9   :  { %v68_v21 = vsel %vm67_vm0, %v36_v18, %v57_v19 }
  0xfc   :  { %v65_v20 = vpop.permute.xlu1 %64 }
  0xfd   :  { %v61_v22 = vpop.permute.xlu0 %60 }
  0xfe   :  { %v70_v23 = vsel %vm69_vm1, %v68_v21, %v61_v22 }
  0xff   :  { %v292_v24 = vsel %vm71_vm2, %v70_v23, %v65_v20 }
 0x100   :  { %v76_v25 = vand.u32 2139095040, %v292_v24  ;;  %v73_v29 = vand.u32 2147483647, %v292_v24  ;;  %vm75_vm10 = vcmp.lt.s32.totalorder %v292_v24, 0  ;;  %vm165_vm15 = vweird.f32 %v292_v24 }
 0x102   :  { %v77_v26 = vshrl.u32 %v76_v25, 23  ;;  %v80_v32 = vand.u32 8388607, %v73_v29  ;;  %vm74_vm11 = vcmp.le.f32.partialorder %v73_v29, 0.7853982 }
 0x104   :  { %v194_v27 = vadd.s32 4294967169, %v77_v26  ;;  %v81_v51 = vor.u32 8388608, %v80_v32 }
 0x106   :  { %v83_v28 = vadd.s32 1, %v194_v27  ;;  %v121_v1 = vshll.u32 %v81_v51, 8 }
 0x108   :  { %vm84_vm3 = vcmp.gt.s32.totalorder %v83_v28, 0 }
 0x109   :  { %v85_v30 = vsel %vm84_vm3, %v83_v28, 0 }
 0x10a   :  { %v87_v31 = vand.u32 31, %v85_v30  ;;  %v86_v34 = vshrl.u32 %v85_v30, 5 }
 0x10c   :  { %v88_v33 = vsub.s32 32, %v87_v31  ;;  %v90_v36 = vshll.u32 %v256_v35, %v87_v31  ;;  %v93_v38 = vshll.u32 %v257_v37, %v87_v31  ;;  %v96_v42 = vshll.u32 %v258_v40, %v87_v31 }
 0x10d   :  { %v99_v45 = vshll.u32 %v259_v43, %v87_v31  ;;  %v102_v48 = vshll.u32 %v260_v46, %v87_v31  ;;  %vm105_vm4 = vcmp.lt.s32.totalorder %v86_v34, 1  ;;  %vm108_vm5 = vcmp.lt.s32.totalorder %v86_v34, 4 }
 0x10e   :  { %v91_v39 = vshrl.u32 %v257_v37, %v88_v33  ;;  %v94_v41 = vshrl.u32 %v258_v40, %v88_v33  ;;  %v97_v44 = vshrl.u32 %v259_v43, %v88_v33  ;;  %v100_v47 = vshrl.u32 %v260_v46, %v88_v33 }
 0x10f   :  { %v103_v50 = vshrl.u32 %v261_v49, %v88_v33  ;;  %v89_v60 = vshrl.u32 %v256_v35, %v88_v33  ;;  %vm107_vm6 = vcmp.lt.s32.totalorder %v86_v34, 3  ;;  %vm106_vm7 = vcmp.lt.s32.totalorder %v86_v34, 2 }
 0x110   :  { %v92_v52 = vor.u32 %v91_v39, %v90_v36  ;;  %v95_v53 = vor.u32 %v94_v41, %v93_v38  ;;  %v98_v54 = vor.u32 %v97_v44, %v96_v42  ;;  %v101_v55 = vor.u32 %v100_v47, %v99_v45 }
 0x111   :  { %v104_v56 = vor.u32 %v103_v50, %v102_v48 }
 0x112   :  { %v110_v57 = vsel %vm108_vm5, %v98_v54, 2102212464  ;;  %v113_v58 = vsel %vm105_vm4, %v92_v52, %v95_v53  ;;  %v117_v59 = vsel %vm105_vm4, %v95_v53, %v98_v54  ;;  %v114_v61 = vsel %vm108_vm5, %v101_v55, 920167782 }
 0x113   :  { %v118_v62 = vsel %vm108_vm5, %v104_v56, 1326507024  ;;  %v115_v63 = vsel %vm107_vm6, %v98_v54, %v114_v61  ;;  %v109_v2 = vsel %vm105_vm4, %v89_v60, %v92_v52  ;;  %v111_v3 = vsel %vm107_vm6, %v95_v53, %v110_v57 }
 0x114   :  { %v119_v0 = vsel %vm107_vm6, %v101_v55, %v118_v62  ;;  %v116_v4 = vsel %vm106_vm7, %v113_v58, %v115_v63  ;;  %v112_v10 = vsel %vm106_vm7, %v109_v2, %v111_v3 }
 0x115   :  { %v120_v5 = vsel %vm106_vm7, %v117_v59, %v119_v0  ;;  %v301_v8 = vmul.u32.u64.low %v121_v1, %v116_v4  ;;  %v302_v9 = vmul.u32.u64.high %v121_v1, %v116_v4, %v301_v8  ;;  %v128_v12 = vmul.u32 %v121_v1, %v112_v10 }
 0x116   :  { %v298_v6 = vmul.u32.u64.low %v121_v1, %v120_v5  ;;  %v299_v7 = vmul.u32.u64.high %v121_v1, %v120_v5, %v298_v6 }
 0x117   :  { %v131_v11 = vadd.s32 1, %v302_v9 }
 0x118   :  { %vm130_vm8 = vc.u32 %v299_v7, %v301_v8  ;;  %v129_v25 = vadd.s32 %v301_v8, %v299_v7 }
 0x119   :  { %v132_v13 = vsel %vm130_vm8, %v131_v11, %v302_v9 }
 0x11a   :  { %v133_v14 = vadd.s32 %v132_v13, %v128_v12 }
 0x11c   :  { %v134_v15 = vadd.s32 536870912, %v133_v14 }
 0x11e   :  { %v135_v16 = vshrl.u32 %v134_v15, 30 }
 0x120   :  { %v136_v17 = vshll.u32 %v135_v16, 30  ;;  %v159_v38 = vsub.s32 4, %v135_v16 }
 0x122   :  { %v137_v18 = vsub.s32 %v133_v14, %v136_v17  ;;  %v160_v41 = vsel %vm75_vm10, %v159_v38, %v135_v16 }
 0x123   :  { %v162_v43 = vsel %vm74_vm11, 0, %v160_v41 }
 0x124   :  { %v139_v19 = vsub.s32 0, %v137_v18  ;;  %v166_v44 = vadd.s32 3, %v162_v43 }
 0x126   :  { %v195_v20 = vmin.u32 %v139_v19, %v137_v18  ;;  %v167_v45 = vand.u32 3, %v166_v44 }
 0x128   :  { %v141_v21 = vclz %v195_v20  ;;  %vm172_vm12 = vcmp.eq.s32.totalorder %v167_v45, 2  ;;  %vm169_vm13 = vcmp.eq.s32.totalorder %v167_v45, 0  ;;  %vm168_vm14 = vcmp.lt.s32.totalorder %v167_v45, 2 }
 0x12a   :  { %v196_v22 = vadd.s32 4294967294, %v141_v21 }
 0x12c   :  { %vm197_vm9 = vcmp.lt.s32.totalorder %v196_v22, 0 }
 0x12d   :  { %v144_v23 = vsel %vm197_vm9, 0, %v196_v22 }
 0x12e   :  { %v145_v26 = vsub.s32 32, %v144_v23  ;;  %v149_v27 = vsub.s32 4294967266, %v144_v23  ;;  %v146_v28 = vshll.u32 %v137_v18, %v144_v23 }
 0x130   :  { %v147_v30 = vshrl.u32 %v129_v25, %v145_v26  ;;  %v150_v31 = vadd.s32 127, %v149_v27 }
 0x132   :  { %v148_v32 = vor.u32 %v147_v30, %v146_v28  ;;  %v151_v33 = vshll.u32 %v150_v31, 23 }
 0x134   :  { %v152_v34 = vor.u32 4788187, %v151_v33  ;;  %v155_v36 = vcvt.s32.f32 %v148_v32 }
 0x136   :  { %v153_v35 = vand.u32 2147483647, %v152_v34 }
 0x138   :  { %v156_v37 = vmul.f32 %v155_v36, %v153_v35 }
 0x13a   :  { %v157_v39 = vxor.u32 2147483648, %v156_v37 }
 0x13c   :  { %v158_v40 = vsel %vm75_vm10, %v157_v39, %v156_v37 }
 0x13d   :  { %v161_v42 = vsel %vm74_vm11, %v292_v24, %v158_v40 }
 0x13e   :  { %221 = vcosq.f32 %v161_v42 }
 0x13f   :  { %223 = vsinq.f32 %v161_v42 }
 0x148   :  { %v222_v46 = vpop.eup %221 }
 0x149   :  { %v224_v47 = vpop.eup %223  ;;  %v173_v48 = vxor.u32 2147483648, %v222_v46 }
 0x14a   :  { %v170_v49 = vxor.u32 2147483648, %v224_v47 }
 0x14b   :  { %v174_v50 = vsel %vm172_vm12, %v173_v48, %v224_v47 }
 0x14c   :  { %v171_v29 = vsel %vm169_vm13, %v222_v46, %v170_v49 }
 0x14d   :  { %v175_v51 = vsel %vm168_vm14, %v171_v29, %v174_v50 }
 0x14e   :  { %v176_v52 = vsel %vm165_vm15, nan, %v175_v51 }
 0x14f   :  { %177 = vst [vmem:[#allocation2] sm:$0xff] %v176_v52 }
 0x150   :  { %236 = shalt.err (!%p233_p4)
}
 0x151   :  { %s237_s23 = scalar_lea.hbm %s328_s3, 128 }
 0x152   :  { %p238_p5 = scmp.ne.s32.totalorder %s328_s3, %s237_s23  ;;  %p241_p6 = scmp.lt.u32.totalorder %s237_s23, %s328_s3 }
 0x154   :  { %p243_p7 = pnand %p241_p6, %p238_p5 }
 0x156   :  { %246 = shalt.err (!%p243_p7)
}
 0x157   :  { %187 = dma.vmem_to_hbm [thread:$0]  %s185_s19, 128, %s328_s3, [#allocation3]  }
 0x158   :  { %247 = dma.done.wait [#allocation3], 128  }
 0x159   :  { %248 = vsyncadd [#allocation3], 4294967168 }
 0x15a   :  { %191 = vsyncpa [#allocation3], 1 }

</bundles_post_ra>
